<compile_context>
chip_gen: v7x
topology: tpu7x:2x2x1
jax: 0.10.0
libtpu: 0.0.40
codegen_flags: <defaults>
</compile_context>

<pallas_src>
import jax
import jax.numpy as jnp
from jax.experimental import pallas as pl
from jax.experimental.pallas import tpu as pltpu

OUT_LANES = 128  # lane-dense output row: [desc, gen, perc, kld, 0, ...]


# ----------------------------- kernel helpers -----------------------------
def _bce_with_logits_mean(logits, targets):
    # numerically stable BCEWithLogitsLoss (mean reduction), matches PyTorch.
    return jnp.mean(jnp.maximum(logits, 0.0) - logits * targets
                    + jnp.log1p(jnp.exp(-jnp.abs(logits))))


# --------------------------------- kernel ---------------------------------
def vae_gan_loss_kernel(xt_sil_ref, xr_sil_ref, xt_col_ref, xr_col_ref,
                        w1_ref, b1_ref, w2_ref, b2_ref, mu_ref, logvar_ref,
                        out_ref, acc_t_ref, acc_r_ref):
    p = pl.program_id(0)                 # 0 = silhouette disc, 1 = color disc
    k = pl.program_id(1)                 # contraction (feature) tile index
    k_last = pl.num_programs(1) - 1

    @pl.when(k == 0)
    def _init():
        acc_t_ref[...] = jnp.zeros_like(acc_t_ref)
        acc_r_ref[...] = jnp.zeros_like(acc_r_ref)

    w1_tile = w1_ref[...]                # (TK, Hd) bf16, shared real & fake

    @pl.when(p == 0)
    def _sil_step():
        acc_t_ref[...] += jnp.dot(xt_sil_ref[...], w1_tile,
                                  preferred_element_type=jnp.float32)
        # rendered silhouette is kept un-expanded (B, F/3); the same tile is
        # multiplied against every channel block of w1_sil, equivalent to the
        # PyTorch .expand(-1, 3, -1, -1, -1) without materializing it in HBM.
        acc_r_ref[...] += jnp.dot(xr_sil_ref[...], w1_tile,
                                  preferred_element_type=jnp.float32)

    @pl.when(p == 1)
    def _col_step():
        acc_t_ref[...] += jnp.dot(xt_col_ref[...], w1_tile,
                                  preferred_element_type=jnp.float32)
        acc_r_ref[...] += jnp.dot(xr_col_ref[...], w1_tile,
                                  preferred_element_type=jnp.float32)

    @pl.when(k == k_last)
    def _finalize():
        b1 = b1_ref[...]                 # (1, Hd) f32
        w2 = w2_ref[...]                 # (1, Hd) f32
        b2 = b2_ref[...]                 # (1, 1)  f32
        h_t = jnp.maximum(acc_t_ref[...] + b1, 0.0)       # target features
        h_r = jnp.maximum(acc_r_ref[...] + b1, 0.0)       # rendered features
        logits_t = jnp.sum(h_t * w2, axis=1, keepdims=True) + b2   # (B, 1)
        logits_r = jnp.sum(h_r * w2, axis=1, keepdims=True) + b2   # (B, 1)

        # ---- discriminator ("critic") loss: BCE(cat(real,fake), cat(.9,.1))
        # TODO(synk): adv_net_*_optim.zero_grad()/backward()/step() (in-forward
        # discriminator weight updates) have no forward-pass Pallas
        # equivalent; generator terms therefore use the pre-step weights.
        loss_desc = 0.5 * (_bce_with_logits_mean(logits_t, 0.9)
                           + _bce_with_logits_mean(logits_r, 0.1))
        # ---- generator GAN term: fake logits vs. all-ones labels
        loss_gen = _bce_with_logits_mean(logits_r, 1.0)
        # ---- perceptual loss
        # TODO(synk): adv_net.perc_loss is external/unspecified in the module;
        # implemented as feature-matching MSE on the hidden layer.
        loss_perc = jnp.mean((h_r - h_t) ** 2)

        mu = mu_ref[...]
        lv = logvar_ref[...]
        kld = -0.5 * jnp.mean(1.0 + lv - mu * mu - jnp.exp(lv))

        lane = jax.lax.broadcasted_iota(jnp.int32, out_ref.shape, 1)
        row = jnp.where(lane == 0, loss_desc,
              jnp.where(lane == 1, loss_gen,
              jnp.where(lane == 2, loss_perc,
              jnp.where(lane == 3, kld, 0.0))))
        out_ref[...] = row.astype(jnp.float32)


# -------------------------------- wrapper ----------------------------------
def _pick_tk(f3, cap=1024):
    """Largest multiple-of-128 divisor of f3, capped (VMEM-safe on v7x too)."""
    best = 0
    t = 128
    while t <= min(f3, cap):
        if f3 % t == 0:
            best = t
        t += 128
    return best


def vae_loss_gan(mu, logvar, rendered_images, rendered_silhouttes,
                 target_renders, target_silhouttes, batch_size, params,
                 kld_coef=1.0, p_loss_coef=1.0, clamp=True,
                 clamp_threshold=100.0):
    w1, b1, w2, b2 = params            # stacked: [0] = sil net, [1] = col net
    B = rendered_images.shape[0]
    C = rendered_images.shape[1]
    assert C == 3, "color renders must have 3 channels"
    F3 = int(rendered_silhouttes.shape[2] * rendered_silhouttes.shape[3]
             * rendered_silhouttes.shape[4])
    F = C * F3
    Hd = w1.shape[-1]
    Z = mu.shape[1]
    assert w1.shape == (2, F, Hd)

    TK = _pick_tk(F3)
    if TK == 0:
        raise ValueError("per-channel feature count must be a multiple of 128")
    n_per_ch = F3 // TK
    K = C * n_per_ch

    # 2-D (batch, feature) slabs, streamed as bf16 (halves HBM bytes; matmuls
    # accumulate in f32).  Rendered silhouette stays un-expanded: (B, F3).
    def to_bf16(x):
        return x if x.dtype == jnp.bfloat16 else x.astype(jnp.bfloat16)

    xt_sil = to_bf16(target_silhouttes.reshape(B, F))
    xr_sil = to_bf16(rendered_silhouttes.reshape(B, F3))
    xt_col = to_bf16(target_renders.reshape(B, F))
    xr_col = to_bf16(rendered_images.reshape(B, F))
    w1 = to_bf16(w1)
    b1 = b1.astype(jnp.float32)
    w2 = w2.astype(jnp.float32)
    b2 = b2.astype(jnp.float32)
    mu = mu.astype(jnp.float32)
    logvar = logvar.astype(jnp.float32)

    # Index maps: p selects the discriminator, k walks the contraction dim.
    # Inputs the current p does not use keep a constant block index so their
    # DMA is skipped after the first fetch (pure scalar-int arithmetic).
    sil_map = lambda p, k: (0, k * (1 - p))
    sil_small_map = lambda p, k: (0, (k % n_per_ch) * (1 - p))
    col_map = lambda p, k: (0, k * p)
    const_map = lambda p, k: (0, 0)

    in_specs = [
        pl.BlockSpec((B, TK), sil_map),                          # xt_sil
        pl.BlockSpec((B, TK), sil_small_map),                    # xr_sil
        pl.BlockSpec((B, TK), col_map),                          # xt_col
        pl.BlockSpec((B, TK), col_map),                          # xr_col
        pl.BlockSpec((None, TK, Hd), lambda p, k: (p, k, 0)),    # w1 stack
        pl.BlockSpec((None, 1, Hd), lambda p, k: (p, 0, 0)),     # b1 stack
        pl.BlockSpec((None, 1, Hd), lambda p, k: (p, 0, 0)),     # w2 stack
        pl.BlockSpec((None, 1, 1), lambda p, k: (p, 0, 0)),      # b2 stack
        pl.BlockSpec((B, Z), const_map),                         # mu
        pl.BlockSpec((B, Z), const_map),                         # logvar
    ]
    out_spec = pl.BlockSpec((None, 1, OUT_LANES), lambda p, k: (p, 0, 0))

    cost = pl.CostEstimate(
        flops=int(2 * 4 * B * F * Hd),
        transcendentals=int(8 * B + B * Z),
        bytes_accessed=int(2 * (3 * B * F + 3 * B * F3 + 2 * F * Hd)
                           + 4 * (2 * B * Z + 2 * 2 * Hd)))

    partials = pl.pallas_call(
        vae_gan_loss_kernel,
        out_shape=jax.ShapeDtypeStruct((2, 1, OUT_LANES), jnp.float32),
        grid_spec=pltpu.PrefetchScalarGridSpec(
            num_scalar_prefetch=0,
            grid=(2, K),
            in_specs=in_specs,
            out_specs=out_spec,
            scratch_shapes=[pltpu.VMEM((B, Hd), jnp.float32),   # target feats
                            pltpu.VMEM((B, Hd), jnp.float32)],  # rendered feats
        ),
        compiler_params=pltpu.CompilerParams(
            dimension_semantics=("parallel", "arbitrary"),
            vmem_limit_bytes=32 * 1024 * 1024),
        cost_estimate=cost,
    )(xt_sil, xr_sil, xt_col, xr_col, w1, b1, w2, b2, mu, logvar)

    desc_sil = partials[0, 0, 0]
    gen_sil = partials[0, 0, 1]
    p_sil = partials[0, 0, 2]
    kld = partials[0, 0, 3]
    desc_col = partials[1, 0, 0]
    gen_col = partials[1, 0, 1]
    p_col = partials[1, 0, 2]

    gan_loss = gen_sil + gen_col
    loss_gen = gan_loss + kld_coef * kld + p_loss_coef * (p_col + p_sil)
    # Matches the PyTorch module: (loss_gen / batch_size).mean() — the extra
    # batch_size division is what the spec does (mean of a scalar is a no-op).
    loss_gen = loss_gen / batch_size
    if clamp:
        loss_gen = jnp.clip(loss_gen, -clamp_threshold, clamp_threshold)
    return loss_gen, jnp.stack([desc_sil, desc_col])


# --------------------------- pure-JAX reference -----------------------------
def _reference(mu, logvar, rendered_images, rendered_silhouttes,
               target_renders, target_silhouttes, batch_size, params,
               kld_coef, p_loss_coef, clamp, clamp_threshold):
    w1, b1, w2, b2 = params
    B = rendered_images.shape[0]
    F = w1.shape[1]
    rsil = jnp.broadcast_to(rendered_silhouttes,
                            (B, 3) + rendered_silhouttes.shape[2:])
    xt_sil = target_silhouttes.reshape(B, F)
    xr_sil = rsil.reshape(B, F)
    xt_col = target_renders.reshape(B, F)
    xr_col = rendered_images.reshape(B, F)

    def disc(x, i):
        h = jnp.maximum(
            jnp.dot(x.astype(jnp.bfloat16), w1[i].astype(jnp.bfloat16),
                    preferred_element_type=jnp.float32)
            + b1[i].astype(jnp.float32), 0.0)
        logits = (jnp.sum(h * w2[i].astype(jnp.float32), axis=1, keepdims=True)
                  + b2[i].astype(jnp.float32))
        return h, logits

    def bce(x, y):
        return jnp.mean(jnp.maximum(x, 0.0) - x * y
                        + jnp.log1p(jnp.exp(-jnp.abs(x))))

    h_ts, log_ts = disc(xt_sil, 0)
    h_rs, log_rs = disc(xr_sil, 0)
    h_tc, log_tc = disc(xt_col, 1)
    h_rc, log_rc = disc(xr_col, 1)

    desc_sil = 0.5 * (bce(log_ts, 0.9) + bce(log_rs, 0.1))
    desc_col = 0.5 * (bce(log_tc, 0.9) + bce(log_rc, 0.1))
    gan = bce(log_rs, 1.0) + bce(log_rc, 1.0)
    kld = -0.5 * jnp.mean(1.0 + logvar - mu * mu - jnp.exp(logvar))
    p_sil = jnp.mean((h_rs - h_ts) ** 2)
    p_col = jnp.mean((h_rc - h_tc) ** 2)
    loss = (gan + kld_coef * kld + p_loss_coef * (p_col + p_sil)) / batch_size
    if clamp:
        loss = jnp.clip(loss, -clamp_threshold, clamp_threshold)
    return loss, jnp.stack([desc_sil, desc_col])


# ----------------------------------- main -----------------------------------
if __name__ == "__main__":
    B, Z, V, Himg, Wimg = 2, 32, 2, 8, 8
    Hd = 128
    F3 = V * Himg * Wimg      # 128 (per-channel features)
    F = 3 * F3                # 384

    key = jax.random.PRNGKey(0)
    ks = jax.random.split(key, 12)

    # Synthetic adversarial-net parameters, stacked [0]=silhouette, [1]=color
    # (the nets are externally supplied modules in the PyTorch spec).
    w1 = (jax.random.normal(ks[0], (2, F, Hd), jnp.float32) * 0.02
          ).astype(jnp.bfloat16)
    b1 = jax.random.normal(ks[1], (2, 1, Hd), jnp.float32) * 0.01
    w2 = jax.random.normal(ks[2], (2, 1, Hd), jnp.float32) * 0.02
    b2 = jax.random.normal(ks[3], (2, 1, 1), jnp.float32) * 0.01
    params = (w1, b1, w2, b2)

    mu = jax.random.normal(ks[4], (B, Z), jnp.float32)
    logvar = jax.random.normal(ks[5], (B, Z), jnp.float32) * 0.1
    rendered_images = jax.random.normal(
        ks[6], (B, 3, V, Himg, Wimg), jnp.float32).astype(jnp.bfloat16)
    target_renders = jax.random.normal(
        ks[7], (B, 3, V, Himg, Wimg), jnp.float32).astype(jnp.bfloat16)
    rendered_silhouttes = jax.random.uniform(
        ks[8], (B, 1, V, Himg, Wimg), jnp.float32).astype(jnp.bfloat16)
    target_silhouttes = jax.random.uniform(
        ks[9], (B, 3, V, Himg, Wimg), jnp.float32).astype(jnp.bfloat16)

    batch_size = B
    kld_coef, p_loss_coef = 1.0, 1.0
    clamp, clamp_threshold = True, 100.0

    loss, desc_losses = vae_loss_gan(
        mu, logvar, rendered_images, rendered_silhouttes,
        target_renders, target_silhouttes, batch_size, params,
        kld_coef=kld_coef, p_loss_coef=p_loss_coef,
        clamp=clamp, clamp_threshold=clamp_threshold)
    loss = jax.block_until_ready(loss)
    desc_losses = jax.block_until_ready(desc_losses)

    ref_loss, ref_desc = _reference(
        mu, logvar, rendered_images, rendered_silhouttes,
        target_renders, target_silhouttes, batch_size, params,
        kld_coef, p_loss_coef, clamp, clamp_threshold)

    assert jnp.isfinite(loss), "non-finite loss"
    assert jnp.allclose(loss, ref_loss, rtol=2e-3, atol=2e-3), (loss, ref_loss)
    assert jnp.allclose(desc_losses, ref_desc, rtol=2e-3, atol=2e-3), (
        desc_losses, ref_desc)
    print("KERNEL_OK")
</pallas_src>

<mosaic_0001>
module attributes {stable_mosaic.version = 11 : i64} {
  func.func @vae_gan_loss_kernel(%arg0: i32, %arg1: i32, %arg2: memref<2x128xbf16, #tpu.memory_space<vmem>>, %arg3: memref<2x128xbf16, #tpu.memory_space<vmem>>, %arg4: memref<2x128xbf16, #tpu.memory_space<vmem>>, %arg5: memref<2x128xbf16, #tpu.memory_space<vmem>>, %arg6: memref<1x128x128xbf16, #tpu.memory_space<vmem>>, %arg7: memref<1x1x128xf32, #tpu.memory_space<vmem>>, %arg8: memref<1x1x128xf32, #tpu.memory_space<vmem>>, %arg9: memref<1x1x1xf32, #tpu.memory_space<vmem>>, %arg10: memref<2x32xf32, #tpu.memory_space<vmem>>, %arg11: memref<2x32xf32, #tpu.memory_space<vmem>>, %arg12: memref<1x1x128xf32, #tpu.memory_space<vmem>>, %arg13: memref<2x128xf32, #tpu.memory_space<vmem>>, %arg14: memref<2x128xf32, #tpu.memory_space<vmem>>) attributes {dimension_semantics = [#tpu.dimension_semantics<parallel>, #tpu.dimension_semantics<arbitrary>], iteration_bounds = array<i64: 2, 3>, scalar_prefetch = 0 : i64, scratch_operands = 2 : i64, tpu.core_type = #tpu.core_type<tc>, window_params = [{transform_indices = @transform_0, window_bounds = array<i64: 2, 128>}, {transform_indices = @transform_1, window_bounds = array<i64: 2, 128>}, {transform_indices = @transform_2, window_bounds = array<i64: 2, 128>}, {transform_indices = @transform_3, window_bounds = array<i64: 2, 128>}, {transform_indices = @transform_4, window_bounds = array<i64: 1, 128, 128>}, {transform_indices = @transform_5, window_bounds = array<i64: 1, 1, 128>}, {transform_indices = @transform_6, window_bounds = array<i64: 1, 1, 128>}, {transform_indices = @transform_7, window_bounds = array<i64: 1, 1, 1>}, {pipeline_mode = #tpu.pipeline_mode<synchronous>, transform_indices = @transform_8, window_bounds = array<i64: 2, 32>}, {pipeline_mode = #tpu.pipeline_mode<synchronous>, transform_indices = @transform_9, window_bounds = array<i64: 2, 32>}, {transform_indices = @transform_10, window_bounds = array<i64: 1, 1, 128>}]} {
    %c0_i32 = arith.constant 0 : i32
    %0 = arith.cmpi eq, %arg1, %c0_i32 : i32
    %1 = arith.extui %0 : i1 to i32
    %c0_i32_0 = arith.constant 0 : i32
    %2 = arith.cmpi ne, %1, %c0_i32_0 : i32
    scf.if %2 {
      %cst = arith.constant 0.000000e+00 : f32
      %14 = vector.broadcast %cst : f32 to vector<2x128xf32>
      %c0_7 = arith.constant 0 : index
      %c0_8 = arith.constant 0 : index
      %15 = vector.load %arg13[%c0_7, %c0_8] : memref<2x128xf32, #tpu.memory_space<vmem>>, vector<2x128xf32>
      tpu.vector_store %arg13[%c0_7, %c0_8], %14 {strides = array<i32>} : memref<2x128xf32, #tpu.memory_space<vmem>>, vector<2x128xf32>,
      %cst_9 = arith.constant 0.000000e+00 : f32
      %16 = vector.broadcast %cst_9 : f32 to vector<2x128xf32>
      %c0_10 = arith.constant 0 : index
      %c0_11 = arith.constant 0 : index
      %17 = vector.load %arg14[%c0_10, %c0_11] : memref<2x128xf32, #tpu.memory_space<vmem>>, vector<2x128xf32>
      tpu.vector_store %arg14[%c0_10, %c0_11], %16 {strides = array<i32>} : memref<2x128xf32, #tpu.memory_space<vmem>>, vector<2x128xf32>,
    } else {
    }
    %c0 = arith.constant 0 : index
    %c0_1 = arith.constant 0 : index
    %c0_2 = arith.constant 0 : index
    %3 = vector.load %arg6[%c0, %c0_1, %c0_2] : memref<1x128x128xbf16, #tpu.memory_space<vmem>>, vector<1x128x128xbf16>
    %4 = vector.shape_cast %3 : vector<1x128x128xbf16> to vector<128x128xbf16>
    %c0_i32_3 = arith.constant 0 : i32
    %5 = arith.cmpi eq, %arg0, %c0_i32_3 : i32
    %6 = arith.extui %5 : i1 to i32
    %c0_i32_4 = arith.constant 0 : i32
    %7 = arith.cmpi ne, %6, %c0_i32_4 : i32
    scf.if %7 {
      %c0_7 = arith.constant 0 : index
      %c0_8 = arith.constant 0 : index
      %14 = vector.load %arg13[%c0_7, %c0_8] : memref<2x128xf32, #tpu.memory_space<vmem>>, vector<2x128xf32>
      %c0_9 = arith.constant 0 : index
      %c0_10 = arith.constant 0 : index
      %15 = vector.load %arg2[%c0_9, %c0_10] : memref<2x128xbf16, #tpu.memory_space<vmem>>, vector<2x128xbf16>
      %cst = arith.constant dense<0.000000e+00> : vector<2x128xf32>
      %16 = tpu.matmul %15, %4, %cst {dimension_numbers = #tpu.dot_dimension_numbers<[1], [0], [0], [1], [0, 0, 1, 1], [], []>} : vector<2x128xbf16>, vector<128x128xbf16>, vector<2x128xf32> -> vector<2x128xf32>
      %17 = arith.addf %14, %16 : vector<2x128xf32>
      %c0_11 = arith.constant 0 : index
      %c0_12 = arith.constant 0 : index
      %18 = vector.load %arg13[%c0_11, %c0_12] : memref<2x128xf32, #tpu.memory_space<vmem>>, vector<2x128xf32>
      tpu.vector_store %arg13[%c0_11, %c0_12], %17 {strides = array<i32>} : memref<2x128xf32, #tpu.memory_space<vmem>>, vector<2x128xf32>,
      %c0_13 = arith.constant 0 : index
      %c0_14 = arith.constant 0 : index
      %19 = vector.load %arg14[%c0_13, %c0_14] : memref<2x128xf32, #tpu.memory_space<vmem>>, vector<2x128xf32>
      %c0_15 = arith.constant 0 : index
      %c0_16 = arith.constant 0 : index
      %20 = vector.load %arg3[%c0_15, %c0_16] : memref<2x128xbf16, #tpu.memory_space<vmem>>, vector<2x128xbf16>
      %cst_17 = arith.constant dense<0.000000e+00> : vector<2x128xf32>
      %21 = tpu.matmul %20, %4, %cst_17 {dimension_numbers = #tpu.dot_dimension_numbers<[1], [0], [0], [1], [0, 0, 1, 1], [], []>} : vector<2x128xbf16>, vector<128x128xbf16>, vector<2x128xf32> -> vector<2x128xf32>
      %22 = arith.addf %19, %21 : vector<2x128xf32>
      %c0_18 = arith.constant 0 : index
      %c0_19 = arith.constant 0 : index
      %23 = vector.load %arg14[%c0_18, %c0_19] : memref<2x128xf32, #tpu.memory_space<vmem>>, vector<2x128xf32>
      tpu.vector_store %arg14[%c0_18, %c0_19], %22 {strides = array<i32>} : memref<2x128xf32, #tpu.memory_space<vmem>>, vector<2x128xf32>,
    } else {
    }
    %c1_i32 = arith.constant 1 : i32
    %8 = arith.cmpi eq, %arg0, %c1_i32 : i32
    %9 = arith.extui %8 : i1 to i32
    %c0_i32_5 = arith.constant 0 : i32
    %10 = arith.cmpi ne, %9, %c0_i32_5 : i32
    scf.if %10 {
      %c0_7 = arith.constant 0 : index
      %c0_8 = arith.constant 0 : index
      %14 = vector.load %arg13[%c0_7, %c0_8] : memref<2x128xf32, #tpu.memory_space<vmem>>, vector<2x128xf32>
      %c0_9 = arith.constant 0 : index
      %c0_10 = arith.constant 0 : index
      %15 = vector.load %arg4[%c0_9, %c0_10] : memref<2x128xbf16, #tpu.memory_space<vmem>>, vector<2x128xbf16>
      %cst = arith.constant dense<0.000000e+00> : vector<2x128xf32>
      %16 = tpu.matmul %15, %4, %cst {dimension_numbers = #tpu.dot_dimension_numbers<[1], [0], [0], [1], [0, 0, 1, 1], [], []>} : vector<2x128xbf16>, vector<128x128xbf16>, vector<2x128xf32> -> vector<2x128xf32>
      %17 = arith.addf %14, %16 : vector<2x128xf32>
      %c0_11 = arith.constant 0 : index
      %c0_12 = arith.constant 0 : index
      %18 = vector.load %arg13[%c0_11, %c0_12] : memref<2x128xf32, #tpu.memory_space<vmem>>, vector<2x128xf32>
      tpu.vector_store %arg13[%c0_11, %c0_12], %17 {strides = array<i32>} : memref<2x128xf32, #tpu.memory_space<vmem>>, vector<2x128xf32>,
      %c0_13 = arith.constant 0 : index
      %c0_14 = arith.constant 0 : index
      %19 = vector.load %arg14[%c0_13, %c0_14] : memref<2x128xf32, #tpu.memory_space<vmem>>, vector<2x128xf32>
      %c0_15 = arith.constant 0 : index
      %c0_16 = arith.constant 0 : index
      %20 = vector.load %arg5[%c0_15, %c0_16] : memref<2x128xbf16, #tpu.memory_space<vmem>>, vector<2x128xbf16>
      %cst_17 = arith.constant dense<0.000000e+00> : vector<2x128xf32>
      %21 = tpu.matmul %20, %4, %cst_17 {dimension_numbers = #tpu.dot_dimension_numbers<[1], [0], [0], [1], [0, 0, 1, 1], [], []>} : vector<2x128xbf16>, vector<128x128xbf16>, vector<2x128xf32> -> vector<2x128xf32>
      %22 = arith.addf %19, %21 : vector<2x128xf32>
      %c0_18 = arith.constant 0 : index
      %c0_19 = arith.constant 0 : index
      %23 = vector.load %arg14[%c0_18, %c0_19] : memref<2x128xf32, #tpu.memory_space<vmem>>, vector<2x128xf32>
      tpu.vector_store %arg14[%c0_18, %c0_19], %22 {strides = array<i32>} : memref<2x128xf32, #tpu.memory_space<vmem>>, vector<2x128xf32>,
    } else {
    }
    %c2_i32 = arith.constant 2 : i32
    %11 = arith.cmpi eq, %arg1, %c2_i32 : i32
    %12 = arith.extui %11 : i1 to i32
    %c0_i32_6 = arith.constant 0 : i32
    %13 = arith.cmpi ne, %12, %c0_i32_6 : i32
    scf.if %13 {
      %c0_7 = arith.constant 0 : index
      %c0_8 = arith.constant 0 : index
      %c0_9 = arith.constant 0 : index
      %14 = vector.load %arg7[%c0_7, %c0_8, %c0_9] : memref<1x1x128xf32, #tpu.memory_space<vmem>>, vector<1x1x128xf32>
      %15 = vector.shape_cast %14 : vector<1x1x128xf32> to vector<1x128xf32>
      %c0_10 = arith.constant 0 : index
      %c0_11 = arith.constant 0 : index
      %c0_12 = arith.constant 0 : index
      %16 = vector.load %arg8[%c0_10, %c0_11, %c0_12] : memref<1x1x128xf32, #tpu.memory_space<vmem>>, vector<1x1x128xf32>
      %17 = vector.shape_cast %16 : vector<1x1x128xf32> to vector<1x128xf32>
      %c0_13 = arith.constant 0 : index
      %c0_14 = arith.constant 0 : index
      %c0_15 = arith.constant 0 : index
      %18 = vector.load %arg9[%c0_13, %c0_14, %c0_15] : memref<1x1x1xf32, #tpu.memory_space<vmem>>, vector<1x1x1xf32>
      %19 = vector.shape_cast %18 : vector<1x1x1xf32> to vector<1x1xf32>
      %c0_16 = arith.constant 0 : index
      %c0_17 = arith.constant 0 : index
      %20 = vector.load %arg13[%c0_16, %c0_17] : memref<2x128xf32, #tpu.memory_space<vmem>>, vector<2x128xf32>
      %21 = vector.broadcast %15 : vector<1x128xf32> to vector<2x128xf32>
      %22 = arith.addf %20, %21 : vector<2x128xf32>
      %cst = arith.constant 0.000000e+00 : f32
      %23 = vector.broadcast %cst : f32 to vector<2x128xf32>
      %24 = arith.maximumf %22, %23 : vector<2x128xf32>
      %c0_18 = arith.constant 0 : index
      %c0_19 = arith.constant 0 : index
      %25 = vector.load %arg14[%c0_18, %c0_19] : memref<2x128xf32, #tpu.memory_space<vmem>>, vector<2x128xf32>
      %26 = vector.broadcast %15 : vector<1x128xf32> to vector<2x128xf32>
      %27 = arith.addf %25, %26 : vector<2x128xf32>
      %cst_20 = arith.constant 0.000000e+00 : f32
      %28 = vector.broadcast %cst_20 : f32 to vector<2x128xf32>
      %29 = arith.maximumf %27, %28 : vector<2x128xf32>
      %30 = vector.broadcast %17 : vector<1x128xf32> to vector<2x128xf32>
      %31 = arith.mulf %24, %30 : vector<2x128xf32>
      %cst_21 = arith.constant dense<0.000000e+00> : vector<2xf32>
      %32 = vector.multi_reduction <add>, %31, %cst_21 [1] : vector<2x128xf32> to vector<2xf32>
      %33 = vector.shape_cast %32 : vector<2xf32> to vector<2x1xf32>
      %34 = vector.broadcast %19 : vector<1x1xf32> to vector<2x1xf32>
      %35 = arith.addf %33, %34 : vector<2x1xf32>
      %36 = vector.broadcast %17 : vector<1x128xf32> to vector<2x128xf32>
      %37 = arith.mulf %29, %36 : vector<2x128xf32>
      %cst_22 = arith.constant dense<0.000000e+00> : vector<2xf32>
      %38 = vector.multi_reduction <add>, %37, %cst_22 [1] : vector<2x128xf32> to vector<2xf32>
      %39 = vector.shape_cast %38 : vector<2xf32> to vector<2x1xf32>
      %40 = vector.broadcast %19 : vector<1x1xf32> to vector<2x1xf32>
      %41 = arith.addf %39, %40 : vector<2x1xf32>
      %cst_23 = arith.constant 0.000000e+00 : f32
      %42 = vector.broadcast %cst_23 : f32 to vector<2x1xf32>
      %43 = arith.maximumf %35, %42 : vector<2x1xf32>
      %cst_24 = arith.constant 0.899999976 : f32
      %44 = vector.broadcast %cst_24 : f32 to vector<2x1xf32>
      %45 = arith.mulf %35, %44 : vector<2x1xf32>
      %46 = arith.subf %43, %45 : vector<2x1xf32>
      %47 = math.absf %35 : vector<2x1xf32>
      %cst_25 = arith.constant 0.000000e+00 : f32
      %48 = vector.broadcast %cst_25 : f32 to vector<2x1xf32>
      %49 = arith.subf %48, %47 : vector<2x1xf32>
      %50 = math.exp %49 : vector<2x1xf32>
      %51 = math.log1p %50 : vector<2x1xf32>
      %52 = arith.addf %46, %51 : vector<2x1xf32>
      %53 = vector.shape_cast %52 : vector<2x1xf32> to vector<1x2x1xf32>
      %cst_26 = arith.constant dense<0.000000e+00> : vector<1xf32>
      %54 = vector.multi_reduction <add>, %53, %cst_26 [1, 2] : vector<1x2x1xf32> to vector<1xf32>
      %55 = vector.shape_cast %54 : vector<1xf32> to vector<1x1x1xf32>
      %56 = vector.extract %55[0, 0, 0] : f32 from vector<1x1x1xf32>
      %cst_27 = arith.constant 2.000000e+00 : f32
      %57 = arith.divf %56, %cst_27 : f32
      %cst_28 = arith.constant 0.000000e+00 : f32
      %58 = vector.broadcast %cst_28 : f32 to vector<2x1xf32>
      %59 = arith.maximumf %41, %58 : vector<2x1xf32>
      %cst_29 = arith.constant 1.000000e-01 : f32
      %60 = vector.broadcast %cst_29 : f32 to vector<2x1xf32>
      %61 = arith.mulf %41, %60 : vector<2x1xf32>
      %62 = arith.subf %59, %61 : vector<2x1xf32>
      %63 = math.absf %41 : vector<2x1xf32>
      %cst_30 = arith.constant 0.000000e+00 : f32
      %64 = vector.broadcast %cst_30 : f32 to vector<2x1xf32>
      %65 = arith.subf %64, %63 : vector<2x1xf32>
      %66 = math.exp %65 : vector<2x1xf32>
      %67 = math.log1p %66 : vector<2x1xf32>
      %68 = arith.addf %62, %67 : vector<2x1xf32>
      %69 = vector.shape_cast %68 : vector<2x1xf32> to vector<1x2x1xf32>
      %cst_31 = arith.constant dense<0.000000e+00> : vector<1xf32>
      %70 = vector.multi_reduction <add>, %69, %cst_31 [1, 2] : vector<1x2x1xf32> to vector<1xf32>
      %71 = vector.shape_cast %70 : vector<1xf32> to vector<1x1x1xf32>
      %72 = vector.extract %71[0, 0, 0] : f32 from vector<1x1x1xf32>
      %cst_32 = arith.constant 2.000000e+00 : f32
      %73 = arith.divf %72, %cst_32 : f32
      %74 = arith.addf %57, %73 : f32
      %cst_33 = arith.constant 5.000000e-01 : f32
      %75 = arith.mulf %cst_33, %74 : f32
      %cst_34 = arith.constant 0.000000e+00 : f32
      %76 = vector.broadcast %cst_34 : f32 to vector<2x1xf32>
      %77 = arith.maximumf %41, %76 : vector<2x1xf32>
      %cst_35 = arith.constant 1.000000e+00 : f32
      %78 = vector.broadcast %cst_35 : f32 to vector<2x1xf32>
      %79 = arith.mulf %41, %78 : vector<2x1xf32>
      %80 = arith.subf %77, %79 : vector<2x1xf32>
      %81 = math.absf %41 : vector<2x1xf32>
      %cst_36 = arith.constant 0.000000e+00 : f32
      %82 = vector.broadcast %cst_36 : f32 to vector<2x1xf32>
      %83 = arith.subf %82, %81 : vector<2x1xf32>
      %84 = math.exp %83 : vector<2x1xf32>
      %85 = math.log1p %84 : vector<2x1xf32>
      %86 = arith.addf %80, %85 : vector<2x1xf32>
      %87 = vector.shape_cast %86 : vector<2x1xf32> to vector<1x2x1xf32>
      %cst_37 = arith.constant dense<0.000000e+00> : vector<1xf32>
      %88 = vector.multi_reduction <add>, %87, %cst_37 [1, 2] : vector<1x2x1xf32> to vector<1xf32>
      %89 = vector.shape_cast %88 : vector<1xf32> to vector<1x1x1xf32>
      %90 = vector.extract %89[0, 0, 0] : f32 from vector<1x1x1xf32>
      %cst_38 = arith.constant 2.000000e+00 : f32
      %91 = arith.divf %90, %cst_38 : f32
      %92 = arith.subf %29, %24 : vector<2x128xf32>
      %93 = arith.mulf %92, %92 : vector<2x128xf32>
      %94 = vector.shape_cast %93 : vector<2x128xf32> to vector<1x2x128xf32>
      %cst_39 = arith.constant dense<0.000000e+00> : vector<1xf32>
      %95 = vector.multi_reduction <add>, %94, %cst_39 [1, 2] : vector<1x2x128xf32> to vector<1xf32>
      %96 = vector.shape_cast %95 : vector<1xf32> to vector<1x1x1xf32>
      %97 = vector.extract %96[0, 0, 0] : f32 from vector<1x1x1xf32>
      %cst_40 = arith.constant 2.560000e+02 : f32
      %98 = arith.divf %97, %cst_40 : f32
      %c0_41 = arith.constant 0 : index
      %c0_42 = arith.constant 0 : index
      %99 = vector.load %arg10[%c0_41, %c0_42] : memref<2x32xf32, #tpu.memory_space<vmem>>, vector<2x32xf32>
      %c0_43 = arith.constant 0 : index
      %c0_44 = arith.constant 0 : index
      %100 = vector.load %arg11[%c0_43, %c0_44] : memref<2x32xf32, #tpu.memory_space<vmem>>, vector<2x32xf32>
      %cst_45 = arith.constant 1.000000e+00 : f32
      %101 = vector.broadcast %cst_45 : f32 to vector<2x32xf32>
      %102 = arith.addf %101, %100 : vector<2x32xf32>
      %103 = arith.mulf %99, %99 : vector<2x32xf32>
      %104 = arith.subf %102, %103 : vector<2x32xf32>
      %105 = math.exp %100 : vector<2x32xf32>
      %106 = arith.subf %104, %105 : vector<2x32xf32>
      %107 = vector.shape_cast %106 : vector<2x32xf32> to vector<1x2x32xf32>
      %cst_46 = arith.constant dense<0.000000e+00> : vector<1xf32>
      %108 = vector.multi_reduction <add>, %107, %cst_46 [1, 2] : vector<1x2x32xf32> to vector<1xf32>
      %109 = vector.shape_cast %108 : vector<1xf32> to vector<1x1x1xf32>
      %110 = vector.extract %109[0, 0, 0] : f32 from vector<1x1x1xf32>
      %cst_47 = arith.constant 6.400000e+01 : f32
      %111 = arith.divf %110, %cst_47 : f32
      %cst_48 = arith.constant -5.000000e-01 : f32
      %112 = arith.mulf %cst_48, %111 : f32
      %113 = tpu.iota {dimensions = array<i32: 1>} : vector<1x128xi32>
      %c0_i32_49 = arith.constant 0 : i32
      %114 = vector.broadcast %c0_i32_49 : i32 to vector<1x128xi32>
      %115 = arith.cmpi eq, %113, %114 : vector<1x128xi32>
      %c1_i32_50 = arith.constant 1 : i32
      %116 = vector.broadcast %c1_i32_50 : i32 to vector<1x128xi32>
      %117 = arith.cmpi eq, %113, %116 : vector<1x128xi32>
      %c2_i32_51 = arith.constant 2 : i32
      %118 = vector.broadcast %c2_i32_51 : i32 to vector<1x128xi32>
      %119 = arith.cmpi eq, %113, %118 : vector<1x128xi32>
      %c3_i32 = arith.constant 3 : i32
      %120 = vector.broadcast %c3_i32 : i32 to vector<1x128xi32>
      %121 = arith.cmpi eq, %113, %120 : vector<1x128xi32>
      %cst_52 = arith.constant 0.000000e+00 : f32
      %122 = vector.broadcast %112 : f32 to vector<1x128xf32>
      %123 = vector.broadcast %cst_52 : f32 to vector<1x128xf32>
      %124 = arith.select %121, %122, %123 : vector<1x128xi1>, vector<1x128xf32>
      %125 = vector.broadcast %98 : f32 to vector<1x128xf32>
      %126 = arith.select %119, %125, %124 : vector<1x128xi1>, vector<1x128xf32>
      %127 = vector.broadcast %91 : f32 to vector<1x128xf32>
      %128 = arith.select %117, %127, %126 : vector<1x128xi1>, vector<1x128xf32>
      %129 = vector.broadcast %75 : f32 to vector<1x128xf32>
      %130 = arith.select %115, %129, %128 : vector<1x128xi1>, vector<1x128xf32>
      %c0_53 = arith.constant 0 : index
      %c0_54 = arith.constant 0 : index
      %c0_55 = arith.constant 0 : index
      %131 = vector.load %arg12[%c0_53, %c0_54, %c0_55] : memref<1x1x128xf32, #tpu.memory_space<vmem>>, vector<1x1x128xf32>
      %132 = vector.shape_cast %131 : vector<1x1x128xf32> to vector<1x128xf32>
      %133 = vector.shape_cast %130 : vector<1x128xf32> to vector<1x1x128xf32>
      tpu.vector_store %arg12[%c0_53, %c0_54, %c0_55], %133 {strides = array<i32>} : memref<1x1x128xf32, #tpu.memory_space<vmem>>, vector<1x1x128xf32>,
    } else {
    }
    return
  }
  func.func @transform_0(%arg0: i32, %arg1: i32) -> (i32, i32) {
    %c1_i32 = arith.constant 1 : i32
    %0 = arith.subi %c1_i32, %arg0 : i32
    %1 = arith.muli %arg1, %0 : i32
    %c0_i32 = arith.constant 0 : i32
    %c0_i32_0 = arith.constant 0 : i32
    return %c0_i32, %1 : i32, i32
  }
  func.func @transform_1(%arg0: i32, %arg1: i32) -> (i32, i32) {
    %c1_i32 = arith.constant 1 : i32
    %c0_i32 = arith.constant 0 : i32
    %0 = arith.cmpi eq, %c1_i32, %c0_i32 : i32
    %c1_i32_0 = arith.constant 1 : i32
    %1 = arith.select %0, %c1_i32_0, %c1_i32 : i32
    %2 = arith.remsi %arg1, %1 : i32
    %c0_i32_1 = arith.constant 0 : i32
    %3 = arith.cmpi ne, %2, %c0_i32_1 : i32
    %c0_i32_2 = arith.constant 0 : i32
    %4 = arith.cmpi slt, %2, %c0_i32_2 : i32
    %c0_i32_3 = arith.constant 0 : i32
    %5 = arith.cmpi slt, %1, %c0_i32_3 : i32
    %6 = arith.xori %4, %5 : i1
    %7 = arith.andi %6, %3 : i1
    %8 = arith.addi %2, %1 : i32
    %9 = arith.select %7, %8, %2 : i32
    %c1_i32_4 = arith.constant 1 : i32
    %10 = arith.subi %c1_i32_4, %arg0 : i32
    %11 = arith.muli %9, %10 : i32
    %c0_i32_5 = arith.constant 0 : i32
    %c0_i32_6 = arith.constant 0 : i32
    return %c0_i32_5, %11 : i32, i32
  }
  func.func @transform_2(%arg0: i32, %arg1: i32) -> (i32, i32) {
    %0 = arith.muli %arg1, %arg0 : i32
    %c0_i32 = arith.constant 0 : i32
    %c0_i32_0 = arith.constant 0 : i32
    return %c0_i32, %0 : i32, i32
  }
  func.func @transform_3(%arg0: i32, %arg1: i32) -> (i32, i32) {
    %0 = arith.muli %arg1, %arg0 : i32
    %c0_i32 = arith.constant 0 : i32
    %c0_i32_0 = arith.constant 0 : i32
    return %c0_i32, %0 : i32, i32
  }
  func.func @transform_4(%arg0: i32, %arg1: i32) -> (i32, i32, i32) {
    %c0_i32 = arith.constant 0 : i32
    %c0_i32_0 = arith.constant 0 : i32
    return %arg0, %arg1, %c0_i32 : i32, i32, i32
  }
  func.func @transform_5(%arg0: i32, %arg1: i32) -> (i32, i32, i32) {
    %c0_i32 = arith.constant 0 : i32
    %c0_i32_0 = arith.constant 0 : i32
    %c0_i32_1 = arith.constant 0 : i32
    return %arg0, %c0_i32, %c0_i32_0 : i32, i32, i32
  }
  func.func @transform_6(%arg0: i32, %arg1: i32) -> (i32, i32, i32) {
    %c0_i32 = arith.constant 0 : i32
    %c0_i32_0 = arith.constant 0 : i32
    %c0_i32_1 = arith.constant 0 : i32
    return %arg0, %c0_i32, %c0_i32_0 : i32, i32, i32
  }
  func.func @transform_7(%arg0: i32, %arg1: i32) -> (i32, i32, i32) {
    %c0_i32 = arith.constant 0 : i32
    %c0_i32_0 = arith.constant 0 : i32
    %c0_i32_1 = arith.constant 0 : i32
    return %arg0, %c0_i32, %c0_i32_0 : i32, i32, i32
  }
  func.func @transform_8(%arg0: i32, %arg1: i32) -> (i32, i32) {
    %c0_i32 = arith.constant 0 : i32
    %c0_i32_0 = arith.constant 0 : i32
    %c0_i32_1 = arith.constant 0 : i32
    return %c0_i32, %c0_i32_0 : i32, i32
  }
  func.func @transform_9(%arg0: i32, %arg1: i32) -> (i32, i32) {
    %c0_i32 = arith.constant 0 : i32
    %c0_i32_0 = arith.constant 0 : i32
    %c0_i32_1 = arith.constant 0 : i32
    return %c0_i32, %c0_i32_0 : i32, i32
  }
  func.func @transform_10(%arg0: i32, %arg1: i32) -> (i32, i32, i32) {
    %c0_i32 = arith.constant 0 : i32
    %c0_i32_0 = arith.constant 0 : i32
    %c0_i32_1 = arith.constant 0 : i32
    return %arg0, %c0_i32, %c0_i32_0 : i32, i32, i32
  }
}

</mosaic_0001>

<bundles_post_ra>
// kernel: tpu_custom_call.1
= control target key start
LH: loop header
LB: loop body
LE: loop exit
PB: predicated region body
PF: predicated region fallthrough
CT: control target
= control target key end

     0   :  { %s2126_s0 = inlined_call_operand.vmem [shape: bf16[2,384], index: 0, kind: input, shape index: {}]   ;;  %s2127_s1 = inlined_call_operand.hbm [shape: bf16[2,128], index: 1, kind: input, shape index: {}]   ;;  %s2128_s2 = inlined_call_operand.vmem [shape: bf16[2,384], index: 2, kind: input, shape index: {}]   ;;  %s2129_s3 = inlined_call_operand.vmem [shape: bf16[2,384], index: 3, kind: input, shape index: {}]   ;;  %s2130_s4 = inlined_call_operand.hbm [shape: bf16[2,384,128], index: 4, kind: input, shape index: {}]   ;;  %s2131_s5 = inlined_call_operand.vmem [shape: f32[2,1,128], index: 5, kind: input, shape index: {}]   ;;  %s2132_s6 = inlined_call_operand.vmem [shape: f32[2,1,128], index: 6, kind: input, shape index: {}]   ;;  %s2133_s7 = inlined_call_operand.vmem [shape: f32[2,1,1], index: 7, kind: input, shape index: {}]   ;;  %s2134_s8 = inlined_call_operand.vmem [shape: f32[2,32], index: 8, kind: input, shape index: {}]   ;;  %s2135_s9 = inlined_call_operand.vmem [shape: f32[2,32], index: 9, kind: input, shape index: {}]   ;;  %s2136_s10 = inlined_call_operand.hbm [shape: f32[2,1,128], index: 10, kind: output, shape index: {}]  }
   0x1   :  { %2154 = sst [smem:[#allocation21_spill]] %s2127_s1 }
   0x2   :  { %2155 = sst [smem:[#allocation22_spill]] %s2130_s4 }
   0x3   :  { %2156 = sst [smem:[#allocation23_spill]] %s2132_s6 }
   0x4   :  { %2157 = sst [smem:[#allocation24_spill]] %s2133_s7 }
   0x5   :  { %2158 = sst [smem:[#allocation25_spill]] %s2134_s8 }
   0x6   :  { %2159 = sst [smem:[#allocation26_spill]] %s2135_s9 }
   0x7   :  { %2160 = sst [smem:[#allocation27_spill]] %s2136_s10 }
   0x8   :  { %15 = vsyncpa [#allocation5], 0 }
   0x9   :  { %16 = vsyncpa [#allocation8], 0 }
   0xa   :  { %18 = vsyncpa [#allocation8 + $0x1], 0 }
   0xb   :  { %19 = vsyncpa [#allocation6], 0 }
   0xc   :  { %21 = vsyncpa [#allocation6 + $0x1], 0  ;;  %s1699_s13 = smov 0   ;;  %s1701_s14 = smov 0  }
   0xd   :  { %s1703_s15 = smov 0   ;;  %s1705_s16 = smov 0  }
   0xe   :  { %s1707_s17 = smov 0   ;;  %s1709_s18 = smov 0  }
   0xf   :  { %s1711_s19 = smov 0   ;;  %s1713_s20 = smov 0  }
  0x10   :  { %s1715_s21 = smov 0   ;;  %s1717_s22 = smov 0  }
  0x11   :  { %s1719_s23 = smov 0  }
  0x12 LB: > { %2161 = sst [smem:[#allocation13_spill]] %s1592_s13  ;;  %s1154_s24 = sadd.s32 4294967295, %s1632_s23   ;;  %s1632_s23 = sphi %s1719_s23, %s27_s23   ;;  %s1628_s22 = sphi %s1717_s22, %s2206_s22   ;;  %s1624_s21 = sphi %s1715_s21, %s2213_s21   ;;  %s1620_s20 = sphi %s1713_s20, %s2204_s20   ;;  %s1616_s19 = sphi %s1711_s19, %s2203_s19   ;;  %s1612_s18 = sphi %s1709_s18, %s2212_s18   ;;  %s1608_s17 = sphi %s1707_s17, %s2211_s17   ;;  %s1604_s16 = sphi %s1705_s16, %s2210_s16   ;;  %s1600_s15 = sphi %s1703_s15, %s2209_s15   ;;  %s1596_s14 = sphi %s1701_s14, %s2208_s14   ;;  %s1592_s13 = sphi %s1699_s13, %s2207_s13  }
  0x13   : > { %2162 = sst [smem:[#allocation14_spill]] %s1624_s21  ;;  %s1155_s25 = sadd.s32 4294967294, %s1632_s23  }
  0x14   : > { %2163 = sst [smem:[#allocation15_spill]] %s1628_s22  ;;  %p162_p0 = scmp.ne.s32.totalorder %s1612_s18, %s1608_s17 }
  0x15   : > { %2164 = sst [smem:[#allocation16_spill]] %s1632_s23  ;;  %p163_p1 = scmp.eq.s32.totalorder %s1632_s23, 0 }
  0x16   : > { %p168_p2 = scmp.ne.s32.totalorder %s1608_s17, %s1604_s16  ;;  %p1759_p3 = scmp.eq.s32.totalorder %s1154_s24, 0 }
  0x17   : > { %p1764_p4 = por %p163_p1, %p162_p0  ;;  %p311_p5 = scmp.ne.s32.totalorder %s1600_s15, %s1596_s14 }
  0x18   : > { %s2165_s27 = scalar_select %p1759_p3, 1, 0 }
  0x19   : > { %p1772_p6 = por %p1759_p3, %p168_p2  ;;  %p312_p7 = scmp.eq.s32.totalorder %s1154_s24, 5 }
  0x1a   : > { %p317_p8 = scmp.ne.s32.totalorder %s1596_s14, %s1592_s13  ;;  %p318_p9 = scmp.eq.s32.totalorder %s1155_s25, 5 }
  0x1b   : > { %s2167_s30 = scalar_select %p1772_p6, 1, 0 }
  0x1c   : > { %p1778_p10 = por %p312_p7, %p311_p5  ;;  %p1156_p11 = scmp.ge.s32.totalorder %s1632_s23, 1 }
  0x1d   : > { %p1783_p12 = por %p318_p9, %p317_p8  ;;  %p325_p13 = scmp.lt.s32.totalorder %s1632_s23, 7 }
  0x1e   : > { %s2168_s11 = scalar_select %p1778_p10, 1, 0 }
  0x1f   : > { %s2170_s12 = scalar_select %p1783_p12, 1, 0 }
  0x20   : > { %2169 = sst [smem:[#allocation17_spill]] %s2168_s11  ;;  %p1788_p0 = pnand %p1156_p11, %p325_p13 }
  0x21   : > { %2171 = sst [smem:[#allocation18_spill]] %s2170_s12  ;;  %s1634_s26 = smov [#allocation4]  }
  0x22   : > { %s2172_s16 = scalar_select %p1788_p0, 1, 0 }
  0x23   : > { %s338_s28 = sshll.u32 %s1634_s26, 4  ;;  %p1326_p1 = pneg %p1788_p0  ;;  %s339_s28 = int_to_ptr.vmem [resolvable:$true] %s338_s28 }
  0x24   : > { %p1339_p2 = scmp.lt.s32.totalorder %s1632_s23, 6  ;;  %s2175_s1 = sld [smem:[#allocation21_spill]] }
  0x25   : > { %p1797_p5 = pnand %p1326_p1, %p1759_p3 }
  0x26   : > { %p1803_p7 = pnand %p1339_p2, %p1764_p4 }
  0x27   : > { %p1450_p9 = pneg %p1797_p5 }
  0x28   : > { %s2174_s25 = scalar_select %p1803_p7, 1, 0 }
  0x2a   : > { %s1448_s10 = scalar_lea.hbm %s2175_s1, 16 }
  0x2b   : > { %p1449_p8 = scmp.ne.s32.totalorder %s2175_s1, %s1448_s10  ;;  %p1455_p1 = scmp.lt.u32.totalorder %s1448_s10, %s2175_s1 }
  0x2d   : > { %p1451_p11 = pnand %p1450_p9, %p1449_p8 }
  0x2f   : > { %p1452_p13 = pneg %p1451_p11 }
  0x31   : > { %p1457_p4 = pnand %p1455_p1, %p1452_p13 }
  0x33   : > { %1460 = shalt.err (!%p1457_p4)
}
  0x34   : > { %s1461_s29 = scalar_lea.vmem %s339_s28, 16  ;;  %s1468_s13 = scalar_lea.vmem %s339_s28, 32 }
  0x35   : > { %p1462_p2 = scmp.ne.s32.totalorder %s339_s28, %s1461_s29  ;;  %p1469_p6 = scmp.lt.s32.totalorder %s339_s28, %s339_s28 }
  0x36   : > { %p1470_p3 = scmp.lt.s32.totalorder %s1468_s13, %s1461_s29 }
  0x37   : > { %p1464_p12 = pnand %p1462_p2, %p1450_p9 }
  0x38   : > { %p1471_p0 = por %p1470_p3, %p1469_p6 }
  0x39   : > { %p1465_p10 = pneg %p1464_p12 }
  0x3b   : > { %p1472_p7 = pnand %p1471_p0, %p1465_p10 }
  0x3d   : > { %1475 = shalt.err (!%p1472_p7)
}
  0x3e   : > { %1329 = dma.hbm_to_vmem [thread:$0]  (!%p1797_p5), %s2175_s1, 16, %s339_s28, [#allocation5]  }
  0x3f   : > { %s36_s8 = sadd.s32 1, %s1624_s21  ;;  %s39_s10 = sadd.s32 1, %s1628_s22 }
  0x40   : > { %p37_p12 = scmp.ge.s32.totalorder %s36_s8, 3  ;;  %s381_s23 = sand.u32 1, %s1612_s18  }
  0x41   : > { %s1159_s26 = sshll.u32 %s381_s23, 6  ;;  %s1160_s29 = sshll.u32 %s1624_s21, 4 }
  0x42   : > { %s2215_s8 = smov (%p37_p12, %s36_s8), 0  ;;  %s2217_s10 = smov (!%p37_p12, %s39_s10), %s1628_s22 }
  0x43   : > { %2176 = sst [smem:[#allocation19_spill]] %s2215_s8  ;;  %s151_s24 = ssub.s32 %s1624_s21, %s2215_s8 }
  0x44   : > { %p41_p3 = scmp.ge.s32.totalorder %s2217_s10, 2  ;;  %s1307_s13 = smul.u32 48, %s1628_s22 }
  0x45   : > { %s385_s11 = scalar_lea.vmem [#allocation7], %s1159_s26  ;;  %s2178_s4 = sld [smem:[#allocation22_spill]] }
  0x46   : > { %s394_s28 = sshll.u32 %s385_s11, 4  ;;  %s2219_s10 = smov (%p41_p3, %s2217_s10), 0  ;;  %s1835_s28 = int_to_ptr.vmem [resolvable:$true] %s394_s28 }
  0x47   : > { %2177 = sst [smem:[#allocation20_spill]] %s2219_s10  ;;  %s391_s12 = sadd.s32 %s1307_s13, %s1160_s29 }
  0x48   : > { %s150_s1 = ssub.s32 %s1628_s22, %s2219_s10  ;;  %s1161_s9 = sshll.u32 %s391_s12, 6 }
  0x49   : > { %s152_s7 = sor.u32 %s151_s24, %s150_s1  ;;  %p299_p6 = scmp.eq.s32.totalorder %s150_s1, 0 }
  0x4a   : > { %p153_p10 = scmp.eq.s32.totalorder %s152_s7, 0  ;;  %s2179_s26 = sadd.s32 1, %s1600_s15 }
  0x4b   : > { %s1842_s21 = scalar_lea.hbm %s2178_s4, %s1161_s9  ;;  %s2180_s29 = sadd.s32 1, %s1612_s18 }
  0x4c   : > { %s1847_s11 = scalar_select %p299_p6, %s1600_s15, %s2179_s26  }
  0x4d   : > { %s1852_s13 = scalar_select %p153_p10, %s1612_s18, %s2180_s29  }
  0x4e   : > { %s1854_s10 = scalar_lea.sflag [#allocation8], %s381_s23  ;;  %s1476_s24 = scalar_lea.hbm %s1842_s21, 1024 }
  0x4f   : > { %p1477_p0 = scmp.ne.s32.totalorder %s1842_s21, %s1476_s24  ;;  %p2181_p5 = scmp.ne.s32.totalorder %s2174_s25, 0 }
  0x50   : > { %s1481_s7 = scalar_lea.hbm %s2178_s4, 6144  ;;  %p1482_p11 = scmp.lt.u32.totalorder %s1842_s21, %s2178_s4 }
  0x51   : > { %p1478_p7 = pneg %p2181_p5  ;;  %p1483_p13 = scmp.lt.u32.totalorder %s1481_s7, %s1476_s24 }
  0x52   : > { %p1485_p4 = scmp.lt.u32.totalorder %s1476_s24, %s1842_s21 }
  0x53   : > { %p1479_p8 = pnand %p1478_p7, %p1477_p0  ;;  %p1484_p1 = por %p1483_p13, %p1482_p11 }
  0x55   : > { %p1480_p9 = pneg %p1479_p8  ;;  %p1486_p2 = por %p1485_p4, %p1484_p1 }
  0x57   : > { %p1487_p12 = pnand %p1486_p2, %p1480_p9 }
  0x59   : > { %1490 = shalt.err (!%p1487_p12)
}
  0x5a   : > { %s1491_s23 = scalar_lea.vmem %s1835_s28, 1024  ;;  %s1635_s12 = smov [#allocation7]  }
  0x5b   : > { %p1492_p3 = scmp.ne.s32.totalorder %s1835_s28, %s1491_s23  ;;  %s1496_s26 = sshll.u32 %s1635_s12, 4  ;;  %s1497_s26 = int_to_ptr.vmem [resolvable:$false] %s1496_s26 }
  0x5c   : > { %s1498_s29 = scalar_lea.vmem %s1497_s26, 2048  ;;  %p1499_p0 = scmp.lt.s32.totalorder %s1835_s28, %s1497_s26 }
  0x5d   : > { %p1494_p6 = pnand %p1492_p3, %p1478_p7  ;;  %p1500_p8 = scmp.lt.s32.totalorder %s1498_s29, %s1491_s23 }
  0x5f   : > { %p1495_p10 = pneg %p1494_p6  ;;  %p1501_p11 = por %p1500_p8, %p1499_p0 }
  0x61   : > { %p1502_p13 = pnand %p1501_p11, %p1495_p10 }
  0x63   : > { %1505 = shalt.err (!%p1502_p13)
}
  0x64   : > { %s1636_s24 = smov 64   ;;  %s1637_s1 = smov 4  }
  0x65   : > { %1333 = dma.hbm_to_vmem [thread:$0]  (!%p2181_p5), %s1842_s21, 1024, %s1835_s28, %s1854_s10, %s1636_s24, %s1636_s24, %s1637_s1  }
  0x66   : > { %p2182_p7 = scmp.ne.s32.totalorder %s2172_s16, 0 }
  0x67   : > { %p2183_p9 = scmp.ne.s32.totalorder (!%p2182_p7), %s2165_s27, 0 }
  0x68   : > { %424 = sbr.rel (%p2182_p7) target bundleno = 1079 (0x437), region = 60 }
  0x6f   : > { %1579 = dma.done.wait (%p2183_p9), [#allocation5], 16  }
  0x70   : > { %1581 = vsyncadd (%p2183_p9), [#allocation5], 4294967280  ;;  %s430_s6 = sand.u32 1, %s1608_s17   ;;  %p2184_p1 = scmp.ne.s32.totalorder %s2167_s30, 0 }
  0x71   : > { %s1164_s7 = sshll.u32 %s430_s6, 6  ;;  %s431_s9 = scalar_lea.sflag [#allocation8], %s430_s6 }
  0x72   : > { %s1889_s8 = scalar_lea.vmem [#allocation7], %s1164_s7 }
  0x73   : > { %1583 = dma.done.wait (%p2184_p1), %s431_s9, 1024  }
  0x74   : > { %1585 = vsyncadd (%p2184_p1), %s431_s9, 4294966272  ;;  %s492_s27 = ssub.s32 1, %s1620_s20  ;;  %s499_s25 = smul.u32 %s1616_s19, %s1620_s20 }
  0x75   : > { %s493_s16 = smul.u32 %s1616_s19, %s492_s27  ;;  %p510_p2 = scmp.lt.s32.totalorder %s1620_s20, 1 }
  0x76   : > { %p500_p4 = scmp.lt.s32.totalorder %s499_s25, 2  ;;  %s2185_s28 = sld [smem:[#allocation23_spill]] }
  0x77   : > { %p494_p5 = scmp.lt.s32.totalorder %s493_s16, 2  ;;  %s2186_s12 = sld [smem:[#allocation24_spill]] }
  0x78   : > { %s2223_s25 = smov (!%p500_p4, %s499_s25), 2  ;;  %s2187_s22 = sand.u32 1, %s1596_s14  }
  0x79   : > { %s2221_s16 = smov (!%p494_p5, %s493_s16), 2  ;;  %s507_s1 = scalar_lea.vmem %s2129_s3, %s2223_s25 }
  0x7a   : > { %s1918_s6 = scalar_select %p510_p2, %s1620_s20, 1 }
  0x7b   : > { %s1934_s29 = scalar_lea.vmem [#allocation9], %s2187_s22  ;;  %p1165_p12 = scmp.ne.s32.totalorder %s1616_s19, 0 }
  0x7c   : > { %s512_s27 = scalar_lea.vmem %s2131_s5, %s1918_s6  ;;  %s515_s21 = scalar_lea.vmem %s2185_s28, %s1918_s6  ;;  %v1638_v0 = vmov (!%p1165_p12), 0.0  }
  0x7d   : > { %s518_s26 = scalar_lea.vmem %s2186_s12, %s1918_s6  ;;  %523 = sbr.rel (%p1165_p12) target bundleno = 132 (0x84), region = 72  ;;  %524 = vst [vmem:[#allocation2] sm:$0x3] (!%p1165_p12), %v1638_v0  ;;  %525 = vst [vmem:[#allocation3] sm:$0x3] (!%p1165_p12), %v1638_v0 }
  0x84 PF: > { %v1938_v1 = vld [vmem:[%s1889_s8] sm:$0xf]  ;;  %v1941_v2 = vld [vmem:[%s1889_s8 + $0x4] sm:$0xf]  ;;  %v1944_v3 = vld [vmem:[%s1889_s8 + $0x8] sm:$0xf] }
  0x85   : > { %v1947_v4 = vld [vmem:[%s1889_s8 + $0xc] sm:$0xf]  ;;  %v1950_v5 = vld [vmem:[%s1889_s8 + $0x10] sm:$0xf]  ;;  %v1953_v6 = vld [vmem:[%s1889_s8 + $0x14] sm:$0xf] }
  0x86   : > { %v1956_v7 = vld [vmem:[%s1889_s8 + $0x18] sm:$0xf]  ;;  %v1959_v8 = vld [vmem:[%s1889_s8 + $0x1c] sm:$0xf]  ;;  %v1962_v9 = vld [vmem:[%s1889_s8 + $0x20] sm:$0xf] }
  0x87   : > { %v1965_v10 = vld [vmem:[%s1889_s8 + $0x24] sm:$0xf]  ;;  %v1968_v11 = vld [vmem:[%s1889_s8 + $0x28] sm:$0xf]  ;;  %v1971_v12 = vld [vmem:[%s1889_s8 + $0x2c] sm:$0xf] }
  0x88   : > { %v1974_v13 = vld [vmem:[%s1889_s8 + $0x30] sm:$0xf]  ;;  %v1977_v14 = vld [vmem:[%s1889_s8 + $0x34] sm:$0xf]  ;;  %v1980_v15 = vld [vmem:[%s1889_s8 + $0x38] sm:$0xf] }
  0x89   : > { %v1983_v16 = vld [vmem:[%s1889_s8 + $0x3c] sm:$0xf]  ;;  %p1166_p3 = scmp.ne.s32.totalorder %s1620_s20, 0 }
  0x8a   : > { %v1167_v17 = vcombine.low (!%p1166_p3), %v1938_v1, %v1941_v2  ;;  %v1639_v18 = vmov (!%p1166_p3), 0.0   ;;  %v1168_v19 = vcombine.low (!%p1166_p3), %v1944_v3, %v1947_v4  ;;  %vm1640_vm0 = vmmov (!%p1166_p3), 0   ;;  %s2188_s8 = scalar_lea.vmem (!%p1166_p3), %s2126_s0, %s2221_s16  ;;  %v639_v27 = vld [vmem:[#allocation4] sm:$0x1] (!%p1166_p3)  ;;  %v546_v28 = vld [vmem:[#allocation2] sm:$0x3] (!%p1166_p3) }
  0x8b   : > { %545 = sbr.rel (%p1166_p3) target bundleno = 386 (0x182), region = 76  ;;  %1227 = vmatprep.subr.bf16.mxu0 (!%p1166_p3), %v1639_v18  ;;  %1247 = vmatprep.subr.bf16.mxu1 (!%p1166_p3), %v1639_v18  ;;  %v1169_v20 = vcombine.low (!%p1166_p3), %v1950_v5, %v1953_v6  ;;  %v1170_v21 = vcombine.low (!%p1166_p3), %v1956_v7, %v1959_v8  ;;  %v1171_v22 = vcombine.low (!%p1166_p3), %v1962_v9, %v1965_v10  ;;  %v547_v26 = vld [vmem:[%s2188_s8] sm:$0x1] (!%p1166_p3)  ;;  %v638_v29 = vld [vmem:[#allocation3] sm:$0x3] (!%p1166_p3) }
  0x8c   : > { %1228 = vmatpush3.bf16.msra.mxu0 (!%p1166_p3), %v1167_v17  ;;  %1248 = vmatpush3.bf16.msra.mxu1 (!%p1166_p3), %v1167_v17  ;;  %v1172_v23 = vcombine.low (!%p1166_p3), %v1968_v11, %v1971_v12  ;;  %v1173_v24 = vcombine.low (!%p1166_p3), %v1974_v13, %v1977_v14  ;;  %v1174_v25 = vcombine.low (!%p1166_p3), %v1980_v15, %v1983_v16 }
  0x8d   : > { %1229 = vmatprep.subr.bf16.mxu0 (!%p1166_p3), %v1639_v18  ;;  %1249 = vmatprep.subr.bf16.mxu1 (!%p1166_p3), %v1639_v18 }
  0x8e   : > { %1243 = vmatprep.mubr.msk.bf16.mxu0 (!%p1166_p3), %vm1640_vm0, %v1639_v18  ;;  %1263 = vmatprep.mubr.msk.bf16.mxu1 (!%p1166_p3), %vm1640_vm0, %v1639_v18 }
  0x90   : > { %1230 = vmatpush3.bf16.msra.mxu0 (!%p1166_p3), %v1168_v19  ;;  %1250 = vmatpush3.bf16.msra.mxu1 (!%p1166_p3), %v1168_v19 }
  0x91   : > { %1231 = vmatprep.subr.bf16.mxu0 (!%p1166_p3), %v1639_v18  ;;  %1251 = vmatprep.subr.bf16.mxu1 (!%p1166_p3), %v1639_v18 }
  0x94   : > { %1232 = vmatpush3.bf16.msra.mxu0 %v1169_v20  ;;  %1252 = vmatpush3.bf16.msra.mxu1 %v1169_v20 }
  0x95   : > { %1233 = vmatprep.subr.bf16.mxu0 %v1639_v18  ;;  %1253 = vmatprep.subr.bf16.mxu1 %v1639_v18 }
  0x98   : > { %1234 = vmatpush3.bf16.msra.mxu0 %v1170_v21  ;;  %1254 = vmatpush3.bf16.msra.mxu1 %v1170_v21 }
  0x99   : > { %1235 = vmatprep.subr.bf16.mxu0 %v1639_v18  ;;  %1255 = vmatprep.subr.bf16.mxu1 %v1639_v18 }
  0x9c   : > { %1236 = vmatpush3.bf16.msra.mxu0 %v1171_v22  ;;  %1256 = vmatpush3.bf16.msra.mxu1 %v1171_v22 }
  0x9d   : > { %1237 = vmatprep.subr.bf16.mxu0 %v1639_v18  ;;  %1257 = vmatprep.subr.bf16.mxu1 %v1639_v18 }
  0xa0   : > { %1238 = vmatpush3.bf16.msra.mxu0 %v1172_v23  ;;  %1258 = vmatpush3.bf16.msra.mxu1 %v1172_v23 }
  0xa1   : > { %1239 = vmatprep.subr.bf16.mxu0 %v1639_v18  ;;  %1259 = vmatprep.subr.bf16.mxu1 %v1639_v18 }
  0xa4   : > { %1240 = vmatpush3.bf16.msra.mxu0 %v1173_v24  ;;  %1260 = vmatpush3.bf16.msra.mxu1 %v1173_v24 }
  0xa5   : > { %1241 = vmatprep.subr.bf16.mxu0 %v1639_v18  ;;  %1261 = vmatprep.subr.bf16.mxu1 %v1639_v18 }
  0xa8   : > { %1242 = vmatpush3.bf16.msra.mxu0 %v1174_v25  ;;  %1262 = vmatpush3.bf16.msra.mxu1 %v1174_v25 }
  0xab   : > { %1244 = vmatmul.mubr.bf16.vlgmr.msra.gmra.mrb[0].mxu0 %v547_v26  ;;  %1264 = vmatmul.mubr.bf16.vlgmr.msra.gmra.mrb[0].mxu1 %v639_v27 }
 0x17e   : > { %v630_v30 = vpop.f32.mrb[0].mxu0  ;;  %v674_v31 = vpop.f32.mrb[0].mxu1 }
 0x17f   : > { %v636_v32 = vadd.f32 %v630_v30, %v546_v28  ;;  %v680_v33 = vadd.f32 %v674_v31, %v638_v29  ;;  %v1245_v34 = vpop.f32.mrb[1].mxu0  ;;  %v1265_v35 = vpop.f32.mrb[1].mxu1 }
 0x180   : > { %v633_v36 = vpop.f32.mrb[2].mxu0  ;;  %v677_v37 = vpop.f32.mrb[2].mxu1 }
 0x181   : > { %637 = vst [vmem:[#allocation2] sm:$0x3] %v636_v32  ;;  %681 = vst [vmem:[#allocation3] sm:$0x3] %v680_v33  ;;  %v1246_v38 = vpop.f32.mrb[3].mxu0  ;;  %v1266_v39 = vpop.f32.mrb[3].mxu1 }
 0x182 PF: > { %p1175_p6 = scmp.ne.s32.totalorder %s1620_s20, 1 }
 0x183   : > { %v1176_v40 = vcombine.low (!%p1175_p6), %v1938_v1, %v1941_v2  ;;  %v1641_v41 = vmov (!%p1175_p6), 0.0   ;;  %v1177_v42 = vcombine.low (!%p1175_p6), %v1944_v3, %v1947_v4  ;;  %vm1642_vm1 = vmmov (!%p1175_p6), 0   ;;  %s2189_s24 = scalar_lea.vmem (!%p1175_p6), %s2128_s2, %s2223_s25  ;;  %v779_v50 = vld [vmem:[%s507_s1] sm:$0x1] (!%p1175_p6) }
 0x184   : > { %685 = sbr.rel (%p1175_p6) target bundleno = 635 (0x27b), region = 80  ;;  %1267 = vmatprep.subr.bf16.mxu0 (!%p1175_p6), %v1641_v41  ;;  %1287 = vmatprep.subr.bf16.mxu1 (!%p1175_p6), %v1641_v41  ;;  %v1178_v43 = vcombine.low (!%p1175_p6), %v1950_v5, %v1953_v6  ;;  %v1179_v44 = vcombine.low (!%p1175_p6), %v1956_v7, %v1959_v8  ;;  %v1180_v45 = vcombine.low (!%p1175_p6), %v1962_v9, %v1965_v10  ;;  %v687_v49 = vld [vmem:[%s2189_s24] sm:$0x1] (!%p1175_p6) }
 0x185   : > { %1268 = vmatpush3.bf16.msra.mxu0 (!%p1175_p6), %v1176_v40  ;;  %1288 = vmatpush3.bf16.msra.mxu1 (!%p1175_p6), %v1176_v40  ;;  %v1181_v46 = vcombine.low (!%p1175_p6), %v1968_v11, %v1971_v12  ;;  %v1182_v47 = vcombine.low (!%p1175_p6), %v1974_v13, %v1977_v14  ;;  %v1183_v48 = vcombine.low (!%p1175_p6), %v1980_v15, %v1983_v16 }
 0x186   : > { %1269 = vmatprep.subr.bf16.mxu0 (!%p1175_p6), %v1641_v41  ;;  %1289 = vmatprep.subr.bf16.mxu1 (!%p1175_p6), %v1641_v41 }
 0x187   : > { %1283 = vmatprep.mubr.msk.bf16.mxu0 (!%p1175_p6), %vm1642_vm1, %v1641_v41  ;;  %1303 = vmatprep.mubr.msk.bf16.mxu1 (!%p1175_p6), %vm1642_vm1, %v1641_v41 }
 0x188   : > { %v686_v51 = vld [vmem:[#allocation2] sm:$0x3] (!%p1175_p6)  ;;  %v778_v52 = vld [vmem:[#allocation3] sm:$0x3] (!%p1175_p6) }
 0x189   : > { %1270 = vmatpush3.bf16.msra.mxu0 (!%p1175_p6), %v1177_v42  ;;  %1290 = vmatpush3.bf16.msra.mxu1 (!%p1175_p6), %v1177_v42 }
 0x18a   : > { %1271 = vmatprep.subr.bf16.mxu0 (!%p1175_p6), %v1641_v41  ;;  %1291 = vmatprep.subr.bf16.mxu1 (!%p1175_p6), %v1641_v41 }
 0x18d   : > { %1272 = vmatpush3.bf16.msra.mxu0 %v1178_v43  ;;  %1292 = vmatpush3.bf16.msra.mxu1 %v1178_v43 }
 0x18e   : > { %1273 = vmatprep.subr.bf16.mxu0 %v1641_v41  ;;  %1293 = vmatprep.subr.bf16.mxu1 %v1641_v41 }
 0x191   : > { %1274 = vmatpush3.bf16.msra.mxu0 %v1179_v44  ;;  %1294 = vmatpush3.bf16.msra.mxu1 %v1179_v44 }
 0x192   : > { %1275 = vmatprep.subr.bf16.mxu0 %v1641_v41  ;;  %1295 = vmatprep.subr.bf16.mxu1 %v1641_v41 }
 0x195   : > { %1276 = vmatpush3.bf16.msra.mxu0 %v1180_v45  ;;  %1296 = vmatpush3.bf16.msra.mxu1 %v1180_v45 }
 0x196   : > { %1277 = vmatprep.subr.bf16.mxu0 %v1641_v41  ;;  %1297 = vmatprep.subr.bf16.mxu1 %v1641_v41 }
 0x199   : > { %1278 = vmatpush3.bf16.msra.mxu0 %v1181_v46  ;;  %1298 = vmatpush3.bf16.msra.mxu1 %v1181_v46 }
 0x19a   : > { %1279 = vmatprep.subr.bf16.mxu0 %v1641_v41  ;;  %1299 = vmatprep.subr.bf16.mxu1 %v1641_v41 }
 0x19d   : > { %1280 = vmatpush3.bf16.msra.mxu0 %v1182_v47  ;;  %1300 = vmatpush3.bf16.msra.mxu1 %v1182_v47 }
 0x19e   : > { %1281 = vmatprep.subr.bf16.mxu0 %v1641_v41  ;;  %1301 = vmatprep.subr.bf16.mxu1 %v1641_v41 }
 0x1a1   : > { %1282 = vmatpush3.bf16.msra.mxu0 %v1183_v48  ;;  %1302 = vmatpush3.bf16.msra.mxu1 %v1183_v48 }
 0x1a4   : > { %1284 = vmatmul.mubr.bf16.vlgmr.msra.gmra.mrb[0].mxu0 %v687_v49  ;;  %1304 = vmatmul.mubr.bf16.vlgmr.msra.gmra.mrb[0].mxu1 %v779_v50 }
 0x277   : > { %v770_v53 = vpop.f32.mrb[0].mxu0  ;;  %v814_v54 = vpop.f32.mrb[0].mxu1 }
 0x278   : > { %v776_v55 = vadd.f32 %v770_v53, %v686_v51  ;;  %v820_v56 = vadd.f32 %v814_v54, %v778_v52  ;;  %v1285_v57 = vpop.f32.mrb[1].mxu0  ;;  %v1305_v58 = vpop.f32.mrb[1].mxu1 }
 0x279   : > { %v773_v59 = vpop.f32.mrb[2].mxu0  ;;  %v817_v60 = vpop.f32.mrb[2].mxu1 }
 0x27a   : > { %777 = vst [vmem:[#allocation2] sm:$0x3] %v776_v55  ;;  %821 = vst [vmem:[#allocation3] sm:$0x3] %v820_v56  ;;  %v1286_v61 = vpop.f32.mrb[3].mxu0  ;;  %v1306_v62 = vpop.f32.mrb[3].mxu1 }
 0x27b PF: > { %p1184_p10 = scmp.ne.s32.totalorder %s1616_s19, 2 }
 0x27c   : > { %v1185_v63 = vld [vmem:[%s512_s27] ss:$0 sm:$0xff] (!%p1184_p10)  ;;  %vm848_vm2 = vcmask (!%p1184_p10), 1041408   ;;  %s2192_s22 = sld [smem:[#allocation26_spill]] (!%p1184_p10)  ;;  %s2193_s8 = sld [smem:[#allocation25_spill]] (!%p1184_p10)  ;;  %vm881_vm4 = vcmask (!%p1184_p10), 1024  }
 0x27d   : > { %825 = sbr.rel (%p1184_p10) target bundleno = 1052 (0x41c), region = 84  ;;  %v1186_v3 = vld [vmem:[%s515_s21] ss:$0 sm:$0xff] (!%p1184_p10)  ;;  %vm965_vm6 = vcmask (!%p1184_p10), 254976  }
 0x27e   : > { %v1187_v14 = vld [vmem:[%s518_s26] ss:$0 sm:$0xff] (!%p1184_p10) }
 0x281   : > { %v829_v0 = vld [vmem:[#allocation2] sm:$0x3] (!%p1184_p10)  ;;  %v838_v2 = vld [vmem:[#allocation3] sm:$0x3] (!%p1184_p10) }
 0x282   : > { %v836_v1 = vadd.f32 (!%p1184_p10), %v1185_v63, %v829_v0  ;;  %v839_v4 = vadd.f32 (!%p1184_p10), %v1185_v63, %v838_v2  ;;  %v958_v27 = vld [vmem:[%s2192_s22] sm:$0x3] (!%p1184_p10) }
 0x283   : > { %v962_v29 = vmul.f32 (!%p1184_p10), 1.442695, %v958_v27  ;;  %v957_v34 = vld [vmem:[%s2193_s8] sm:$0x3] (!%p1184_p10)  ;;  %v959_v39 = vadd.f32 (!%p1184_p10), 1.0, %v958_v27 }
 0x284   : > { %v837_v5 = vmax.f32 %v836_v1, 0.0  ;;  %v840_v6 = vmax.f32 %v839_v4, 0.0  ;;  %v960_v40 = vmul.f32 %v957_v34, %v957_v34 }
 0x286   : > { %v847_v7 = vmul.f32 %v1186_v3, %v837_v5  ;;  %v859_v8 = vmul.f32 %v1186_v3, %v840_v6  ;;  %v942_v11 = vsub.f32 %v840_v6, %v837_v5  ;;  %v961_v51 = vsub.f32 %v959_v39, %v960_v40 }
 0x288   : > { %v849_v9 = vsel %vm848_vm2, %v847_v7, 0.0  ;;  %v860_v10 = vsel %vm848_vm2, %v859_v8, 0.0  ;;  %v943_v12 = vmul.f32 %v942_v11, %v942_v11 }
 0x289   : > { %850 = vadd.xlane.f32.xlu0 %v849_v9 }
 0x28a   : > { %v2045_v13 = vsel %vm848_vm2, %v943_v12, 0.0 }
 0x28d   : > { %861 = vadd.xlane.f32.xlu0 %v860_v10 }
 0x316   : > { %v851_v15 = vpop.xlane.xlu0 %850 }
 0x317   : > { %v858_v16 = vadd.f32 %v1187_v14, %v851_v15 }
 0x319   : > { %v867_v17 = vand.u32 2147483647, %v858_v16  ;;  %v864_v35 = vmax.f32 %v858_v16, 0.0  ;;  %v865_v36 = vmul.f32 0.9, %v858_v16 }
 0x31a   : > { %v862_v18 = vpop.xlane.xlu0 %861 }
 0x31b   : > { %v868_v19 = vsub.f32 0.0, %v867_v17  ;;  %v863_v20 = vadd.f32 %v1187_v14, %v862_v18  ;;  %v866_v45 = vsub.f32 %v864_v35, %v865_v36  ;;  %v980_v36 = vlaneseq }
 0x31d   : > { %v869_v21 = vmul.f32 1.442695, %v868_v19  ;;  %v898_v22 = vand.u32 2147483647, %v863_v20  ;;  %v895_v43 = vmax.f32 %v863_v20, 0.0 }
 0x31e   : > { %v896_v47 = vmul.f32 0.1, %v863_v20 }
 0x31f   : > { %1438 = vpow2.f32 %v869_v21  ;;  %v899_v23 = vsub.f32 0.0, %v898_v22  ;;  %v927_v56 = vsub.f32 %v895_v43, %v863_v20 }
 0x320   : > { %v897_v57 = vsub.f32 %v895_v43, %v896_v47 }
 0x321   : > { %v900_v24 = vmul.f32 1.442695, %v899_v23 }
 0x323   : > { %1440 = vpow2.f32 %v900_v24 }
 0x329   : > { %v1439_v25 = vpop.eup %1438 }
 0x32a   : > { %v871_v26 = vadd.f32 1.0, %v1439_v25  ;;  %v874_v31 = vmul.f32 -0.5, %v1439_v25  ;;  %v877_v37 = vand.u32 2147483647, %v1439_v25 }
 0x32c   : > { %1442 = vlog2.f32 %v871_v26  ;;  %v875_v32 = vadd.f32 1.0, %v874_v31  ;;  %vm878_vm3 = vcmp.lt.f32.partialorder %v877_v37, 0.0004427343  ;;  %v981_v37 = vand.u32 127, %v980_v36 }
 0x32d   : > { %v1441_v28 = vpop.eup %1440 }
 0x32e   : > { %v902_v30 = vadd.f32 1.0, %v1441_v28  ;;  %v905_v33 = vmul.f32 -0.5, %v1441_v28  ;;  %v876_v42 = vmul.f32 %v1439_v25, %v875_v32  ;;  %v908_v46 = vand.u32 2147483647, %v1441_v28 }
 0x32f   : > { %vm985_vm7 = vcmp.eq.s32.totalorder %v981_v37, 3  ;;  %vm984_vm8 = vcmp.eq.s32.totalorder %v981_v37, 2  ;;  %vm983_vm9 = vcmp.eq.s32.totalorder %v981_v37, 1  ;;  %vm982_vm10 = vcmp.eq.s32.totalorder %v981_v37, 0 }
 0x330   : > { %1444 = vlog2.f32 %v902_v30  ;;  %v906_v44 = vadd.f32 1.0, %v905_v33  ;;  %vm909_vm5 = vcmp.lt.f32.partialorder %v908_v46, 0.0004427343 }
 0x331   : > { %1446 = vpow2.f32 %v962_v29 }
 0x332   : > { %v907_v54 = vmul.f32 %v1441_v28, %v906_v44 }
 0x336   : > { %v1443_v38 = vpop.eup %1442 }
 0x337   : > { %v873_v41 = vmul.f32 0.6931472, %v1443_v38 }
 0x339   : > { %v879_v48 = vsel %vm878_vm3, %v876_v42, %v873_v41 }
 0x33a   : > { %v1445_v49 = vpop.eup %1444  ;;  %v880_v50 = vadd.f32 %v879_v48, %v866_v45 }
 0x33b   : > { %v1447_v52 = vpop.eup %1446  ;;  %v904_v53 = vmul.f32 0.6931472, %v1445_v49 }
 0x33c   : > { %v882_v55 = vsel %vm881_vm4, %v880_v50, 0.0  ;;  %v964_v61 = vsub.f32 %v961_v51, %v1447_v52 }
 0x33d   : > { %883 = vadd.xlane.f32.xlu1 %v882_v55  ;;  %v910_v58 = vsel %vm909_vm5, %v907_v54, %v904_v53 }
 0x33e   : > { %v928_v59 = vadd.f32 %v927_v56, %v910_v58  ;;  %v911_v60 = vadd.f32 %v910_v58, %v897_v57  ;;  %v966_v0 = vsel %vm965_vm6, %v964_v61, 0.0 }
 0x340   : > { %v929_v62 = vsel %vm881_vm4, %v928_v59, 0.0  ;;  %v912_v63 = vsel %vm881_vm4, %v911_v60, 0.0 }
 0x341   : > { %930 = vadd.xlane.f32.xlu0 %v929_v62  ;;  %913 = vadd.xlane.f32.xlu1 %v912_v63 }
 0x345   : > { %967 = vadd.xlane.f32.xlu0 %v966_v0  ;;  %945 = vadd.xlane.f32.xlu1 %v2045_v13 }
 0x3ca   : > { %v884_v1 = vpop.xlane.xlu1 %883 }
 0x3cb   : > { %v885_v2 = vrot.slane %v884_v1, 4 }
 0x3cd   : > { %v886_v3 = vadd.f32 %v885_v2, %v884_v1 }
 0x3ce   : > { %v931_v4 = vpop.xlane.xlu0 %930  ;;  %v914_v5 = vpop.xlane.xlu1 %913 }
 0x3cf   : > { %v887_v6 = vrot.slane %v886_v3, 2  ;;  %v932_v7 = vrot.slane %v931_v4, 4  ;;  %v915_v8 = vrot.slane %v914_v5, 4 }
 0x3d1   : > { %v933_v9 = vadd.f32 %v932_v7, %v931_v4  ;;  %v916_v10 = vadd.f32 %v915_v8, %v914_v5  ;;  %v888_v11 = vadd.f32 %v887_v6, %v886_v3 }
 0x3d2   : > { %v968_v12 = vpop.xlane.xlu0 %967  ;;  %v946_v14 = vpop.xlane.xlu1 %945 }
 0x3d3   : > { %v934_v15 = vrot.slane %v933_v9, 2  ;;  %v917_v16 = vrot.slane %v916_v10, 2  ;;  %v969_v17 = vrot.slane %v968_v12, 4  ;;  %v947_v18 = vrot.slane %v946_v14, 4 }
 0x3d4   : > { %v889_v19 = vrot.slane %v888_v11, 1 }
 0x3d5   : > { %v970_v20 = vadd.f32 %v969_v17, %v968_v12  ;;  %v948_v13 = vadd.f32 %v947_v18, %v946_v14  ;;  %v918_v21 = vadd.f32 %v917_v16, %v916_v10  ;;  %v935_v22 = vadd.f32 %v934_v15, %v933_v9 }
 0x3d6   : > { %v890_v23 = vadd.f32 %v889_v19, %v888_v11 }
 0x3d7   : > { %v971_v24 = vrot.slane %v970_v20, 2  ;;  %v949_v25 = vrot.slane %v948_v13, 2  ;;  %v919_v26 = vrot.slane %v918_v21, 1  ;;  %v936_v27 = vrot.slane %v935_v22, 1 }
 0x3d8   : > { %1308 = vpush %v890_v23 }
 0x3d9   : > { %v972_v28 = vadd.f32 %v971_v24, %v970_v20  ;;  %v950_v29 = vadd.f32 %v949_v25, %v948_v13  ;;  %v920_v30 = vadd.f32 %v919_v26, %v918_v21  ;;  %v937_v31 = vadd.f32 %v936_v27, %v935_v22 }
 0x3db   : > { %1310 = vpush %v920_v30  ;;  %v951_v32 = vrot.slane %v950_v29, 1  ;;  %v973_v33 = vrot.slane %v972_v28, 1 }
 0x3dc   : > { %1312 = vpush %v937_v31 }
 0x3dd   : > { %v952_v34 = vadd.f32 %v951_v32, %v950_v29  ;;  %v974_v35 = vadd.f32 %v973_v33, %v972_v28 }
 0x3df   : > { %1314 = vpush %v952_v34 }
 0x3e0   : > { %1316 = vpush %v974_v35 }
 0x409   : > { %s1309_s16 = spop %1308 }
 0x40a   : > { %s894_s9 = smul.f32 0.5, %s1309_s16 }
 0x40c   : > { %s1311_s28 = spop %1310 }
 0x40d   : > { %s924_s24 = smul.f32 0.5, %s1311_s28  ;;  %s1313_s7 = spop %1312 }
 0x40e   : > { %s941_s10 = smul.f32 0.5, %s1313_s7 }
 0x40f   : > { %s925_s30 = sadd.f32 %s924_s24, %s894_s9 }
 0x410   : > { %s1315_s25 = spop %1314  ;;  %v990_v41 = vstv %s941_s10 }
 0x411   : > { %s1317_s1 = spop %1316  ;;  %s956_s19 = smul.f32 0.00390625, %s1315_s25 }
 0x412   : > { %s978_s23 = smul.f32 0.015625, %s1317_s1 }
 0x413   : > { %s926_s12 = smul.f32 0.5, %s925_s30  ;;  %v988_v39 = vstv %s956_s19 }
 0x414   : > { %s979_s27 = smul.f32 -0.5, %s978_s23 }
 0x415   : > { %v992_v43 = vstv %s926_s12 }
 0x416   : > { %v986_v38 = vstv %s979_s27 }
 0x417   : > { %v987_v40 = vsel %vm985_vm7, %v986_v38, 0.0 }
 0x418   : > { %v989_v42 = vsel %vm984_vm8, %v988_v39, %v987_v40 }
 0x419   : > { %v991_v44 = vsel %vm983_vm9, %v990_v41, %v989_v42 }
 0x41a   : > { %v993_v45 = vsel %vm982_vm10, %v992_v43, %v991_v44 }
 0x41b   : > { %994 = vst [vmem:[%s1934_s29] sm:$0x1] %v993_v45 }
 0x41c PF: > { %s2194_s21 = sld [smem:[#allocation17_spill]]  ;;  %s1188_s4 = sshll.u32 %s1620_s20, 4 }
 0x41d   : > { %s2195_s6 = sld [smem:[#allocation27_spill]]  ;;  %s1008_s16 = sshll.u32 %s1934_s29, 4  ;;  %s1009_s16 = int_to_ptr.vmem [resolvable:$true] %s1008_s16 }
 0x41e   : > { %s2196_s28 = sand.u32 1, %s1596_s14   ;;  %s1506_s7 = scalar_lea.vmem %s1009_s16, 16 }
 0x41f   : > { %s996_s24 = scalar_lea.sflag [#allocation6], %s2196_s28  ;;  %p1507_p0 = scmp.ne.s32.totalorder %s1009_s16, %s1506_s7 }
 0x420   : > { %s1643_s9 = smov [#allocation9]  }
 0x421   : > { %s1510_s25 = sshll.u32 %s1643_s9, 4  ;;  %s1511_s25 = int_to_ptr.vmem [resolvable:$false] %s1510_s25 }
 0x422   : > { %p2197_p8 = scmp.ne.s32.totalorder %s2194_s21, 0  ;;  %s1512_s1 = scalar_lea.vmem %s1511_s25, 32 }
 0x423   : > { %s2067_s8 = scalar_lea.hbm %s2195_s6, %s1188_s4  ;;  %p1513_p7 = scmp.lt.s32.totalorder %s1009_s16, %s1511_s25 }
 0x424   : > { %p1508_p11 = pnand %p1507_p0, %p2197_p8  ;;  %p1514_p9 = scmp.lt.s32.totalorder %s1512_s1, %s1506_s7 }
 0x426   : > { %p1509_p13 = pneg %p1508_p11  ;;  %p1515_p1 = por %p1514_p9, %p1513_p7 }
 0x428   : > { %p1516_p5 = pnand %p1515_p1, %p1509_p13 }
 0x42a   : > { %1519 = shalt.err (!%p1516_p5)
}
 0x42b   : > { %s1520_s20 = scalar_lea.hbm %s2067_s8, 16  ;;  %s1524_s10 = scalar_lea.hbm %s2195_s6, 32 }
 0x42c   : > { %p1521_p4 = scmp.ne.s32.totalorder %s2067_s8, %s1520_s20  ;;  %p1525_p3 = scmp.lt.u32.totalorder %s2067_s8, %s2195_s6 }
 0x42d   : > { %p1526_p6 = scmp.lt.u32.totalorder %s1524_s10, %s1520_s20  ;;  %p1528_p0 = scmp.lt.u32.totalorder %s1520_s20, %s2067_s8 }
 0x42e   : > { %p1522_p2 = pnand %p1521_p4, %p2197_p8 }
 0x42f   : > { %p1527_p10 = por %p1526_p6, %p1525_p3 }
 0x430   : > { %p1523_p12 = pneg %p1522_p2 }
 0x431   : > { %p1529_p11 = por %p1528_p0, %p1527_p10 }
 0x433   : > { %p1530_p13 = pnand %p1529_p11, %p1523_p12 }
 0x435   : > { %1533 = shalt.err (!%p1530_p13)
}
 0x436   : > { %1324 = dma.vmem_to_hbm [thread:$0]  (%p2197_p8), %s1009_s16, 16, %s2067_s8, %s996_s24  }
 0x437 PF: > { %s2198_s27 = sld [smem:[#allocation16_spill]]  ;;  %s2199_s12 = sld [smem:[#allocation13_spill]] }
 0x438   : > { %s2200_s4 = sld [smem:[#allocation18_spill]] }
 0x43d   : > { %p1341_p7 = scmp.ge.s32.totalorder %s2198_s27, 2  ;;  %s1020_s22 = sand.u32 1, %s2199_s12  }
 0x43e   : > { %p2201_p9 = scmp.ne.s32.totalorder %s2200_s4, 0  ;;  %s1021_s26 = scalar_lea.sflag [#allocation6], %s1020_s22 }
 0x440   : > { %p1335_p1 = pnand %p1341_p7, %p2201_p9 }
 0x442   : > { %1587 = dma.done.wait (!%p1335_p1), %s1021_s26, 16  }
 0x443   : > { %1589 = vsyncadd (!%p1335_p1), %s1021_s26, 4294967280  ;;  %s27_s23 = sadd.s32 1, %s2198_s27   ;;  %s2202_s21 = smov %s1852_s13 }
 0x444   : > { %p24_p5 = scmp.ge.s32.totalorder %s27_s23, 8   ;;  %s2203_s19 = sld [smem:[#allocation14_spill]] }
 0x445   : > { %s2204_s20 = sld [smem:[#allocation15_spill]]  ;;  %s2205_s8 = sld [smem:[#allocation19_spill]] }
 0x446   : > { %s2206_s22 = sld [smem:[#allocation20_spill]]  ;;  %s2207_s13 = smov %s1596_s14 }
 0x447   : > { %s2208_s14 = smov %s1600_s15  ;;  %s2209_s15 = smov %s1847_s11 }
 0x448   : > { %s2210_s16 = smov %s1608_s17  ;;  %s2211_s17 = smov %s1612_s18 }
 0x449   : > { %s2212_s18 = smov %s2202_s21  ;;  %26 = sbr.rel (!%p24_p5) target bundleno = 18 (0x12), region = 144 }
 0x44b   : > { %s2213_s21 = smov %s2205_s8 }
 0x450   :  { %1025 = vsyncpa [#allocation5], 1 }
 0x451   :  { %1027 = vsyncpa [#allocation5 + $0x1], 1 }
 0x452   :  { %1028 = vsyncpa [#allocation8], 1 }
 0x453   :  { %1030 = vsyncpa [#allocation8 + $0x1], 1 }
 0x454   :  { %1031 = vsyncpa [#allocation6], 1 }
 0x455   :  { %1033 = vsyncpa [#allocation6 + $0x1], 1 }

</bundles_post_ra>
